<compile_context>
chip_gen: v7x
topology: tpu7x:2x2x1
jax: 0.10.0
libtpu: 0.0.40
codegen_flags: <defaults>
</compile_context>

<pallas_src>
import math

import jax
import jax.numpy as jnp
from jax import lax
from jax.experimental import pallas as pl
from jax.experimental.pallas import tpu as pltpu


def _round_up(n, m):
    return ((n + m - 1) // m) * m


def _cdiv(a, b):
    return (a + b - 1) // b


def _pad_to(a, shape):
    if tuple(a.shape) == tuple(shape):
        return a
    return jnp.zeros(shape, a.dtype).at[tuple(slice(0, s) for s in a.shape)].set(a)


def _pick_tile(full, cap, min_tiles=1):
    """full: a 128-multiple extent. Returns (tile, padded_extent, n_tiles)."""
    n = max(min_tiles, _cdiv(full, cap))
    t = _round_up(_cdiv(full, n), 128)
    n = _cdiv(full, t)
    return t, n * t, n


def _parzen_kernel(x_ref, m_ref, a_ref, b_ref, out_ref):
    """Grid = (O tiles [parallel], I tiles [arbitrary; reduction last])."""
    k = pl.program_id(1)

    @pl.when(k == 0)
    def _():
        out_ref[...] = jnp.zeros_like(out_ref)

    # cross[r, j] = sum_i x[r, i] * m[j, i]  -> MXU, f32 accumulation,
    # mikro stays in its native (O, I) layout.
    out_ref[...] += lax.dot_general(
        x_ref[...], m_ref[...], (((1,), (1,)), ((), ())),
        preferred_element_type=jnp.float32)

    @pl.when(k == pl.num_programs(1) - 1)
    def _():
        # arg = coef_j * s_rj  (= a_j * cross_rj + b_rj), coef_j < 0 so the
        # exact value is <= 0; clamp guards expanded-quadratic cancellation.
        arg = a_ref[...] * out_ref[...] + b_ref[...]
        out_ref[...] = jnp.exp(jnp.minimum(arg, 0.0))


def make_parzen_params(mikro, sigma, *, o_tile=1024, i_tile=4096,
                       stream_dtype=jnp.float32):
    """One-time preparation, cached with the parameters (padding + ||m_j||^2).

    In a real module this is done once at parameter-update time so mikro is
    never re-read by XLA per call.
    """
    assert o_tile % 128 == 0 and i_tile % 128 == 0
    out_features, in_features = mikro.shape

    o_full = _round_up(out_features, 128)
    i_full = _round_up(in_features, 128)
    # Grow the reduction (I) tile first; keep >= 2 O tiles when there is
    # enough work so the "parallel" O axis can be split across 2 TCs (v7x).
    o_t, o_pad, _ = _pick_tile(o_full, o_tile, min_tiles=2 if o_full > 128 else 1)
    i_t, i_pad, _ = _pick_tile(i_full, i_tile)

    mikro32 = mikro.astype(jnp.float32)
    sigma32 = sigma.astype(jnp.float32)
    coef = -0.5 / (sigma32 ** 2)                         # (O,)  = -1/(2 sigma^2)
    msq = jnp.sum(mikro32 * mikro32, axis=1)             # (O,)  kept in f32

    m_pad = _pad_to(mikro.astype(stream_dtype), (o_pad, i_pad))
    a_pad = _pad_to((-2.0 * coef).reshape(1, -1), (1, o_pad))      # 1/sigma^2
    coef_pad = _pad_to(coef.reshape(1, -1), (1, o_pad))
    nb_pad = _pad_to((coef * msq).reshape(1, -1), (1, o_pad))      # coef * ||m||^2

    itemsize = jnp.dtype(stream_dtype).itemsize
    min_sub = 8 * (4 // itemsize)    # 8 sublanes for f32, 16 for bf16 packing

    return dict(
        m_pad=m_pad, a_pad=a_pad, coef_pad=coef_pad, nb_pad=nb_pad,
        out_features=out_features, in_features=in_features,
        o_t=o_t, i_t=i_t, o_pad=o_pad, i_pad=i_pad,
        stream_dtype=jnp.dtype(stream_dtype), min_sub=min_sub)


def parzen_window_apply(params, x):
    """x: (in_features,) or (B, in_features) -> (out_features,) / (B, out_features)."""
    squeeze = (x.ndim == 1)
    xb = x[None, :] if squeeze else x
    batch, in_features = xb.shape
    assert in_features == params["in_features"]

    o_t, i_t = params["o_t"], params["i_t"]
    o_pad, i_pad = params["o_pad"], params["i_pad"]
    out_features = params["out_features"]
    stream_dtype = params["stream_dtype"]
    min_sub = params["min_sub"]

    b_pad = max(min_sub, _round_up(batch, min_sub))

    xb32 = xb.astype(jnp.float32)
    xsq = jnp.sum(xb32 * xb32, axis=1, keepdims=True)               # (B, 1), f32
    # b[r, j] = coef_j * (||m_j||^2 + ||x_r||^2); zero in padded rows / cols.
    b_bias = params["nb_pad"] + params["coef_pad"] * _pad_to(xsq, (b_pad, 1))
    x_pad = _pad_to(xb.astype(stream_dtype), (b_pad, i_pad))

    grid = (o_pad // o_t, i_pad // i_t)

    # VMEM budget: double-buffered inputs/outputs + headroom, capped at 48 MiB
    # (v7x has only 64 MiB physical VMEM per TensorCore; don't ask for it all).
    itemsize = stream_dtype.itemsize
    step_bytes = ((o_t * i_t + b_pad * i_t) * itemsize
                  + (2 * b_pad * o_t + 2 * o_t) * 4)
    vmem_limit = int(min(48 << 20, max(16 << 20, 4 * step_bytes)))

    out = pl.pallas_call(
        _parzen_kernel,
        out_shape=jax.ShapeDtypeStruct((b_pad, o_pad), jnp.float32),
        grid_spec=pltpu.PrefetchScalarGridSpec(
            num_scalar_prefetch=0,
            grid=grid,
            in_specs=[
                pl.BlockSpec((b_pad, i_t), lambda o, k: (0, k)),   # x rows
                pl.BlockSpec((o_t, i_t), lambda o, k: (o, k)),     # mikro (O, I)
                pl.BlockSpec((1, o_t), lambda o, k: (0, o)),       # a = 1/sigma^2
                pl.BlockSpec((b_pad, o_t), lambda o, k: (0, o)),   # b bias
            ],
            out_specs=pl.BlockSpec((b_pad, o_t), lambda o, k: (0, o)),
        ),
        compiler_params=pltpu.CompilerParams(
            dimension_semantics=("parallel", "arbitrary"),
            vmem_limit_bytes=vmem_limit,
        ),
    )(x_pad, params["m_pad"], params["a_pad"], b_bias)

    out = out[:batch, :out_features]
    return out[0] if squeeze else out


def parzen_window(x, mikro, sigma, **kwargs):
    """Convenience one-shot wrapper (prep + apply)."""
    return parzen_window_apply(make_parzen_params(mikro, sigma, **kwargs), x)


def reference(x, mikro, sigma):
    s = jnp.sum((mikro - x[None, :]) ** 2, axis=1)
    return jnp.exp(-s / (2.0 * sigma ** 2))


if __name__ == "__main__":
    in_features = 32
    out_features = 16

    key = jax.random.PRNGKey(0)
    k_mikro, k_sigma, k_x, k_xb = jax.random.split(key, 4)

    invsqr = 1.0 / math.sqrt(in_features)
    # mikro ~ U(-invsqr, invsqr); sigma ~ U(invsqr, 1.0)   (torch .uniform_(invsqr))
    mikro = jax.random.uniform(
        k_mikro, (out_features, in_features), jnp.float32, -invsqr, invsqr)
    sigma = jax.random.uniform(
        k_sigma, (out_features,), jnp.float32, invsqr, 1.0)
    # Put x near one of the centers so outputs span a meaningful range.
    x = mikro[3] + 0.05 * jax.random.normal(k_x, (in_features,), jnp.float32)

    params = make_parzen_params(mikro, sigma)

    out = parzen_window_apply(params, x)
    jax.block_until_ready(out)
    ref = reference(x, mikro, sigma)
    assert out.shape == (out_features,)
    assert jnp.allclose(out, ref, atol=1e-5, rtol=1e-4), (out, ref)

    # Small batched call: all rows amortize a single pass over the mikro stream.
    xb = mikro[:4] + 0.05 * jax.random.normal(k_xb, (4, in_features), jnp.float32)
    outb = parzen_window_apply(params, xb)
    jax.block_until_ready(outb)
    refb = jax.vmap(lambda xx: reference(xx, mikro, sigma))(xb)
    assert outb.shape == (4, out_features)
    assert jnp.allclose(outb, refb, atol=1e-5, rtol=1e-4), (outb, refb)

    print("KERNEL_OK")
</pallas_src>

<mosaic_0001>
module attributes {stable_mosaic.version = 11 : i64} {
  func.func @_parzen_kernel(%arg0: i32, %arg1: i32, %arg2: memref<8x128xf32, #tpu.memory_space<vmem>>, %arg3: memref<128x128xf32, #tpu.memory_space<vmem>>, %arg4: memref<1x128xf32, #tpu.memory_space<vmem>>, %arg5: memref<8x128xf32, #tpu.memory_space<vmem>>, %arg6: memref<8x128xf32, #tpu.memory_space<vmem>>) attributes {dimension_semantics = [#tpu.dimension_semantics<parallel>, #tpu.dimension_semantics<arbitrary>], iteration_bounds = array<i64: 1, 1>, scalar_prefetch = 0 : i64, scratch_operands = 0 : i64, tpu.core_type = #tpu.core_type<tc>, window_params = [{transform_indices = @transform_0, window_bounds = array<i64: 8, 128>}, {transform_indices = @transform_1, window_bounds = array<i64: 128, 128>}, {transform_indices = @transform_2, window_bounds = array<i64: 1, 128>}, {transform_indices = @transform_3, window_bounds = array<i64: 8, 128>}, {transform_indices = @transform_4, window_bounds = array<i64: 8, 128>}]} {
    %c0_i32 = arith.constant 0 : i32
    %0 = arith.cmpi eq, %arg1, %c0_i32 : i32
    %1 = arith.extui %0 : i1 to i32
    %c0_i32_0 = arith.constant 0 : i32
    %2 = arith.cmpi ne, %1, %c0_i32_0 : i32
    scf.if %2 {
      %cst_10 = arith.constant 0.000000e+00 : f32
      %12 = vector.broadcast %cst_10 : f32 to vector<8x128xf32>
      %c0_11 = arith.constant 0 : index
      %c0_12 = arith.constant 0 : index
      %13 = vector.load %arg6[%c0_11, %c0_12] : memref<8x128xf32, #tpu.memory_space<vmem>>, vector<8x128xf32>
      tpu.vector_store %arg6[%c0_11, %c0_12], %12 {strides = array<i32>} : memref<8x128xf32, #tpu.memory_space<vmem>>, vector<8x128xf32>,
    } else {
    }
    %c0 = arith.constant 0 : index
    %c0_1 = arith.constant 0 : index
    %3 = vector.load %arg6[%c0, %c0_1] : memref<8x128xf32, #tpu.memory_space<vmem>>, vector<8x128xf32>
    %c0_2 = arith.constant 0 : index
    %c0_3 = arith.constant 0 : index
    %4 = vector.load %arg2[%c0_2, %c0_3] : memref<8x128xf32, #tpu.memory_space<vmem>>, vector<8x128xf32>
    %c0_4 = arith.constant 0 : index
    %c0_5 = arith.constant 0 : index
    %5 = vector.load %arg3[%c0_4, %c0_5] : memref<128x128xf32, #tpu.memory_space<vmem>>, vector<128x128xf32>
    %cst = arith.constant dense<0.000000e+00> : vector<8x128xf32>
    %6 = tpu.matmul %4, %5, %cst {dimension_numbers = #tpu.dot_dimension_numbers<[1], [1], [0], [0], [0, 0, 1, 0], [], []>} : vector<8x128xf32>, vector<128x128xf32>, vector<8x128xf32> -> vector<8x128xf32>
    %7 = arith.addf %3, %6 : vector<8x128xf32>
    %c0_6 = arith.constant 0 : index
    %c0_7 = arith.constant 0 : index
    %8 = vector.load %arg6[%c0_6, %c0_7] : memref<8x128xf32, #tpu.memory_space<vmem>>, vector<8x128xf32>
    tpu.vector_store %arg6[%c0_6, %c0_7], %7 {strides = array<i32>} : memref<8x128xf32, #tpu.memory_space<vmem>>, vector<8x128xf32>,
    %c0_i32_8 = arith.constant 0 : i32
    %9 = arith.cmpi eq, %arg1, %c0_i32_8 : i32
    %10 = arith.extui %9 : i1 to i32
    %c0_i32_9 = arith.constant 0 : i32
    %11 = arith.cmpi ne, %10, %c0_i32_9 : i32
    scf.if %11 {
      %c0_10 = arith.constant 0 : index
      %c0_11 = arith.constant 0 : index
      %12 = vector.load %arg4[%c0_10, %c0_11] : memref<1x128xf32, #tpu.memory_space<vmem>>, vector<1x128xf32>
      %c0_12 = arith.constant 0 : index
      %c0_13 = arith.constant 0 : index
      %13 = vector.load %arg6[%c0_12, %c0_13] : memref<8x128xf32, #tpu.memory_space<vmem>>, vector<8x128xf32>
      %14 = vector.broadcast %12 : vector<1x128xf32> to vector<8x128xf32>
      %15 = arith.mulf %14, %13 : vector<8x128xf32>
      %c0_14 = arith.constant 0 : index
      %c0_15 = arith.constant 0 : index
      %16 = vector.load %arg5[%c0_14, %c0_15] : memref<8x128xf32, #tpu.memory_space<vmem>>, vector<8x128xf32>
      %17 = arith.addf %15, %16 : vector<8x128xf32>
      %cst_16 = arith.constant 0.000000e+00 : f32
      %18 = vector.broadcast %cst_16 : f32 to vector<8x128xf32>
      %19 = arith.minimumf %17, %18 : vector<8x128xf32>
      %20 = math.exp %19 : vector<8x128xf32>
      %c0_17 = arith.constant 0 : index
      %c0_18 = arith.constant 0 : index
      %21 = vector.load %arg6[%c0_17, %c0_18] : memref<8x128xf32, #tpu.memory_space<vmem>>, vector<8x128xf32>
      tpu.vector_store %arg6[%c0_17, %c0_18], %20 {strides = array<i32>} : memref<8x128xf32, #tpu.memory_space<vmem>>, vector<8x128xf32>,
    } else {
    }
    return
  }
  func.func @transform_0(%arg0: i32, %arg1: i32) -> (i32, i32) {
    %c0_i32 = arith.constant 0 : i32
    %c0_i32_0 = arith.constant 0 : i32
    return %c0_i32, %arg1 : i32, i32
  }
  func.func @transform_1(%arg0: i32, %arg1: i32) -> (i32, i32) {
    %c0_i32 = arith.constant 0 : i32
    return %arg0, %arg1 : i32, i32
  }
  func.func @transform_2(%arg0: i32, %arg1: i32) -> (i32, i32) {
    %c0_i32 = arith.constant 0 : i32
    %c0_i32_0 = arith.constant 0 : i32
    return %c0_i32, %arg0 : i32, i32
  }
  func.func @transform_3(%arg0: i32, %arg1: i32) -> (i32, i32) {
    %c0_i32 = arith.constant 0 : i32
    %c0_i32_0 = arith.constant 0 : i32
    return %c0_i32, %arg0 : i32, i32
  }
  func.func @transform_4(%arg0: i32, %arg1: i32) -> (i32, i32) {
    %c0_i32 = arith.constant 0 : i32
    %c0_i32_0 = arith.constant 0 : i32
    return %c0_i32, %arg0 : i32, i32
  }
}

</mosaic_0001>

<bundles_post_ra>
// kernel: tpu_custom_call.1
= control target key start
LH: loop header
LB: loop body
LE: loop exit
PB: predicated region body
PF: predicated region fallthrough
CT: control target
= control target key end

     0   :  { %9 = vsyncpa [#allocation3], 0  ;;  %s414_s0 = inlined_call_operand.hbm [shape: f32[8,128], index: 0, kind: input, shape index: {}]   ;;  %s415_s1 = inlined_call_operand.hbm [shape: f32[128,128], index: 1, kind: input, shape index: {}]   ;;  %s416_s2 = inlined_call_operand.vmem [shape: f32[1,128], index: 2, kind: input, shape index: {}]   ;;  %s417_s3 = inlined_call_operand.vmem [shape: f32[8,128], index: 3, kind: input, shape index: {}]   ;;  %s418_s4 = inlined_call_operand.hbm [shape: f32[8,128], index: 4, kind: output, shape index: {}]  }
   0x1   :  { %10 = vsyncpa [#allocation6], 0 }
   0x2   :  { %11 = vsyncpa [#allocation4], 0  ;;  %s332_s15 = smov [#allocation2]   ;;  %s333_s17 = smov [#allocation5]  }
   0x3   :  { %s18_s16 = sshll.u32 %s332_s15, 4  ;;  %s27_s18 = sshll.u32 %s333_s17, 4  ;;  %s19_s16 = int_to_ptr.vmem [resolvable:$true] %s18_s16  ;;  %s365_s18 = int_to_ptr.vmem [resolvable:$true] %s27_s18 }
   0x4   :  { %s260_s21 = scalar_lea.hbm %s414_s0, 128 }
   0x5   :  { %p261_p0 = scmp.ne.s32.totalorder %s414_s0, %s260_s21  ;;  %p264_p1 = scmp.lt.u32.totalorder %s260_s21, %s414_s0 }
   0x7   :  { %p266_p2 = pnand %p264_p1, %p261_p0 }
   0x9   :  { %269 = shalt.err (!%p266_p2)
}
   0xa   :  { %s270_s26 = scalar_lea.vmem %s19_s16, 128  ;;  %p275_p4 = scmp.lt.s32.totalorder %s19_s16, %s19_s16 }
   0xb   :  { %p271_p3 = scmp.ne.s32.totalorder %s19_s16, %s270_s26  ;;  %p276_p5 = scmp.lt.s32.totalorder %s270_s26, %s270_s26 }
   0xd   :  { %p277_p6 = por %p276_p5, %p275_p4 }
   0xf   :  { %p278_p7 = pnand %p277_p6, %p271_p3 }
  0x11   :  { %281 = shalt.err (!%p278_p7)
}
  0x12   :  { %21 = dma.hbm_to_vmem [thread:$0]  %s414_s0, 128, %s19_s16, [#allocation3]  }
  0x13   :  { %s282_s5 = scalar_lea.hbm %s415_s1, 2048 }
  0x14   :  { %p283_p8 = scmp.ne.s32.totalorder %s415_s1, %s282_s5  ;;  %p286_p9 = scmp.lt.u32.totalorder %s282_s5, %s415_s1 }
  0x16   :  { %p288_p10 = pnand %p286_p9, %p283_p8 }
  0x18   :  { %291 = shalt.err (!%p288_p10)
}
  0x19   :  { %s292_s10 = scalar_lea.vmem %s365_s18, 2048  ;;  %p297_p12 = scmp.lt.s32.totalorder %s365_s18, %s365_s18 }
  0x1a   :  { %p293_p11 = scmp.ne.s32.totalorder %s365_s18, %s292_s10  ;;  %p298_p13 = scmp.lt.s32.totalorder %s292_s10, %s292_s10 }
  0x1c   :  { %p299_p0 = por %p298_p13, %p297_p12 }
  0x1e   :  { %p300_p1 = pnand %p299_p0, %p293_p11 }
  0x20   :  { %303 = shalt.err (!%p300_p1)
}
  0x21   :  { %s334_s0 = smov 128   ;;  %s335_s11 = smov 8  }
  0x22   :  { %33 = dma.hbm_to_vmem [thread:$0]  %s415_s1, 2048, %s365_s18, [#allocation6], %s334_s0, %s334_s0, %s335_s11  }
  0x23   :  { %326 = dma.done.wait [#allocation3], 128  }
  0x24   :  { %327 = vsyncadd [#allocation3], 4294967168 }
  0x25   :  { %328 = dma.done.wait [#allocation6], 2048  }
  0x26   :  { %329 = vsyncadd [#allocation6], 4294965248  ;;  %v336_v0 = vmov 0.0|0.0   ;;  %vm337_vm0 = vmmov 0   ;;  %v338_v1 = vmov 0.0   ;;  %v51_v2 = vld [vmem:[#allocation5] sm:$0xff] }
  0x27   :  { %226 = vmatprep.subr.bf16.mxu0 %v336_v0  ;;  %223 = vmatprep.mubr.msk.f32.mxu0 %vm337_vm0, %v338_v1  ;;  %v52_v3 = vld [vmem:[#allocation5 + $0x8] sm:$0xff]  ;;  %v53_v5 = vld [vmem:[#allocation5 + $0x10] sm:$0xff]  ;;  %v54_v6 = vld [vmem:[#allocation5 + $0x18] sm:$0xff]  ;;  %s339_s17 = smov [#allocation7]  }
  0x28   :  { %v227_v4 = vpack.c.bf16 %v52_v3, %v51_v2  ;;  %v230_v7 = vpack.c.bf16 %v54_v6, %v53_v5  ;;  %v55_v8 = vld [vmem:[#allocation5 + $0x20] sm:$0xff]  ;;  %v56_v9 = vld [vmem:[#allocation5 + $0x28] sm:$0xff]  ;;  %v57_v11 = vld [vmem:[#allocation5 + $0x30] sm:$0xff]  ;;  %s163_s18 = sshll.u32 %s339_s17, 4  ;;  %s164_s18 = int_to_ptr.vmem [resolvable:$true] %s163_s18 }
  0x29   :  { %v233_v10 = vpack.c.bf16 %v56_v9, %v55_v8  ;;  %v58_v12 = vld [vmem:[#allocation5 + $0x38] sm:$0xff]  ;;  %v59_v14 = vld [vmem:[#allocation5 + $0x40] sm:$0xff]  ;;  %v60_v15 = vld [vmem:[#allocation5 + $0x48] sm:$0xff]  ;;  %s304_s19 = scalar_lea.vmem %s164_s18, 128  ;;  %p309_p3 = scmp.lt.s32.totalorder %s164_s18, %s164_s18 }
  0x2a   :  { %228 = vmatpush3.bf16.xpose.msra.mxu0 %v227_v4  ;;  %v236_v13 = vpack.c.bf16 %v58_v12, %v57_v11  ;;  %v239_v16 = vpack.c.bf16 %v60_v15, %v59_v14  ;;  %v61_v17 = vld [vmem:[#allocation5 + $0x50] sm:$0xff]  ;;  %v62_v18 = vld [vmem:[#allocation5 + $0x58] sm:$0xff]  ;;  %v63_v20 = vld [vmem:[#allocation5 + $0x60] sm:$0xff]  ;;  %p305_p2 = scmp.ne.s32.totalorder %s164_s18, %s304_s19  ;;  %p310_p4 = scmp.lt.s32.totalorder %s304_s19, %s304_s19 }
  0x2b   :  { %229 = vmatprep.subr.bf16.mxu0 %v336_v0  ;;  %v242_v19 = vpack.c.bf16 %v62_v18, %v61_v17  ;;  %v64_v21 = vld [vmem:[#allocation5 + $0x68] sm:$0xff]  ;;  %v65_v23 = vld [vmem:[#allocation5 + $0x70] sm:$0xff]  ;;  %v66_v24 = vld [vmem:[#allocation5 + $0x78] sm:$0xff] }
  0x2c   :  { %v245_v22 = vpack.c.bf16 %v64_v21, %v63_v20  ;;  %v248_v25 = vpack.c.bf16 %v66_v24, %v65_v23  ;;  %v50_v26 = vld [vmem:[#allocation2] sm:$0xff]  ;;  %p311_p5 = por %p310_p4, %p309_p3 }
  0x2d   :  { %v173_v28 = vld [vmem:[%s416_s2] ss:$0 sm:$0xff] }
  0x2e   :  { %v151_v30 = vld [vmem:[%s417_s3] sm:$0xff]  ;;  %p312_p6 = pnand %p311_p5, %p305_p2 }
  0x32   :  { %231 = vmatpush3.bf16.xpose.msra.mxu0 %v230_v7 }
  0x33   :  { %232 = vmatprep.subr.bf16.mxu0 %v336_v0 }
  0x3a   :  { %234 = vmatpush3.bf16.xpose.msra.mxu0 %v233_v10 }
  0x3b   :  { %235 = vmatprep.subr.bf16.mxu0 %v336_v0 }
  0x42   :  { %237 = vmatpush3.bf16.xpose.msra.mxu0 %v236_v13 }
  0x43   :  { %238 = vmatprep.subr.bf16.mxu0 %v336_v0 }
  0x4a   :  { %240 = vmatpush3.bf16.xpose.msra.mxu0 %v239_v16 }
  0x4b   :  { %241 = vmatprep.subr.bf16.mxu0 %v336_v0 }
  0x52   :  { %243 = vmatpush3.bf16.xpose.msra.mxu0 %v242_v19 }
  0x53   :  { %244 = vmatprep.subr.bf16.mxu0 %v336_v0 }
  0x5a   :  { %246 = vmatpush3.bf16.xpose.msra.mxu0 %v245_v22 }
  0x5b   :  { %247 = vmatprep.subr.bf16.mxu0 %v336_v0 }
  0x62   :  { %249 = vmatpush3.bf16.xpose.msra.mxu0 %v248_v25 }
  0x69   :  { %224 = vmatmul.mubr.f32.vlgmr.msra.gmra.mrb[0].mxu0 %v50_v26 }
 0x13c   :  { %v133_v27 = vpop.f32.mrb[0].mxu0 }
 0x13d   :  { %v225_v29 = vpop.f32.mrb[1].mxu0  ;;  %v150_v31 = vmul.f32 %v173_v28, %v133_v27 }
 0x13f   :  { %v152_v32 = vadd.f32 %v151_v30, %v150_v31 }
 0x141   :  { %v153_v33 = vmin.f32 %v152_v32, 0.0 }
 0x143   :  { %v154_v34 = vmul.f32 1.442695, %v153_v33 }
 0x145   :  { %258 = vpow2.f32 %v154_v34 }
 0x14f   :  { %v259_v35 = vpop.eup %258 }
 0x150   :  { %156 = vst [vmem:[#allocation7] sm:$0xff] %v259_v35 }
 0x151   :  { %315 = shalt.err (!%p312_p6)
}
 0x152   :  { %s316_s3 = scalar_lea.hbm %s418_s4, 128 }
 0x153   :  { %p317_p7 = scmp.ne.s32.totalorder %s418_s4, %s316_s3  ;;  %p320_p8 = scmp.lt.u32.totalorder %s316_s3, %s418_s4 }
 0x155   :  { %p322_p9 = pnand %p320_p8, %p317_p7 }
 0x157   :  { %325 = shalt.err (!%p322_p9)
}
 0x158   :  { %166 = dma.vmem_to_hbm [thread:$0]  %s164_s18, 128, %s418_s4, [#allocation4]  }
 0x159   :  { %330 = dma.done.wait [#allocation4], 128  }
 0x15a   :  { %331 = vsyncadd [#allocation4], 4294967168 }
 0x15b   :  { %170 = vsyncpa [#allocation3], 1 }
 0x15c   :  { %171 = vsyncpa [#allocation6], 1 }
 0x15d   :  { %172 = vsyncpa [#allocation4], 1 }

</bundles_post_ra>
